<compile_context>
chip_gen: v6e
topology: v6e:2x2x1
jax: 0.10.0
libtpu: 0.0.40
codegen_flags: <defaults>
</compile_context>

<pallas_src>
import functools

import jax
import jax.numpy as jnp
from jax.experimental import pallas as pl
from jax.experimental.pallas import tpu as pltpu


# ----------------------------------------------------------------------------
# VMEM planning
# ----------------------------------------------------------------------------
def _vmem_plan():
    """Return (block-residency budget, vmem_limit_bytes) for this TPU generation."""
    cap = 64 << 20  # conservative default = v7x physical VMEM per TensorCore
    try:
        info = pltpu.get_tpu_info()
        cap = int(getattr(info, "vmem_capacity_bytes", cap))
    except Exception:
        pass
    if cap <= (64 << 20):
        # v7x-class: 64 MiB physical -> keep residency under ~48 MiB.
        limit = 48 << 20
    else:
        # v5e/v6e: 128 MiB physical -> scoped limit can go toward ~100 MiB.
        limit = 100 << 20
    budget = int(limit * 0.85)  # headroom for compiler scratch / regalloc
    return budget, limit


def _round_up(v, m):
    return ((v + m - 1) // m) * m


# ----------------------------------------------------------------------------
# Fused single-pass kernel (full batch resident per feature tile)
# ----------------------------------------------------------------------------
def _bn_fused_kernel(x_ref, gamma_ref, beta_ref, o_ref, *, eps, tc, C):
    x = x_ref[...]                                              # (N, tc), native dtype
    n = x.shape[0]
    inv_n = jnp.float32(1.0 / n)

    # f32 stats accumulation without materializing an f32 copy of the block.
    s = jnp.sum(x, axis=0, keepdims=True, dtype=jnp.float32)       # (1, tc)
    ss = jnp.sum(x * x, axis=0, keepdims=True, dtype=jnp.float32)  # (1, tc)
    mean = s * inv_n
    var = jnp.maximum(ss * inv_n - mean * mean, 0.0)                # biased (ddof=0)
    inv_std = jax.lax.rsqrt(var + eps)

    # gamma/beta are VMEM-resident as full (1, C) blocks; slice our feature tile.
    if tc == C:
        g = gamma_ref[...]
        bt = beta_ref[...]
    else:
        off = pl.multiple_of(pl.program_id(0) * tc, 128)
        g = gamma_ref[:, pl.ds(off, tc)]
        bt = beta_ref[:, pl.ds(off, tc)]

    # Fold normalization + affine into per-feature scale/shift.
    a = g * inv_std                                              # (1, tc) f32
    b = bt - mean * a                                            # (1, tc) f32
    o_ref[...] = (x * a + b).astype(o_ref.dtype)


def _bn_fused(x, gamma, beta, eps, budget, limit):
    N, C = x.shape
    itemsize = x.dtype.itemsize

    if C % 128 == 0:
        # Per feature-column bytes: double-buffered x + double-buffered out
        # blocks + ~2 block-sized f32 temps of headroom.
        per_col = N * (4 * itemsize + 8)
        max_cols = max(128, (budget // per_col) // 128 * 128)
        tc = min(C, max_cols)
        while C % tc != 0:
            tc -= 128
        # v7x megacore: give the single "parallel" axis >= 2 steps when cheap.
        if C // tc < 2 and tc % 256 == 0:
            tc //= 2
    else:
        tc = C  # full-extent block is always legal

    gamma2 = gamma.reshape(1, C).astype(jnp.float32)
    beta2 = beta.reshape(1, C).astype(jnp.float32)
    kernel = functools.partial(_bn_fused_kernel, eps=float(eps), tc=tc, C=C)

    return pl.pallas_call(
        kernel,
        out_shape=jax.ShapeDtypeStruct((N, C), x.dtype),
        grid_spec=pltpu.PrefetchScalarGridSpec(
            num_scalar_prefetch=0,
            grid=(C // tc,),
            in_specs=[
                pl.BlockSpec((N, tc), lambda j: (0, j)),   # x: full batch, feature slice
                pl.BlockSpec((1, C), lambda j: (0, 0)),    # gamma: resident across steps
                pl.BlockSpec((1, C), lambda j: (0, 0)),    # beta:  resident across steps
            ],
            out_specs=pl.BlockSpec((N, tc), lambda j: (0, j)),
        ),
        compiler_params=pltpu.CompilerParams(
            dimension_semantics=("parallel",),
            vmem_limit_bytes=limit,
        ),
        cost_estimate=pl.CostEstimate(
            flops=int(6 * N * C),
            transcendentals=int(C),
            bytes_accessed=int(2 * N * C * itemsize + 8 * C),
        ),
    )(x, gamma2, beta2)


# ----------------------------------------------------------------------------
# Large-N fallback: two-pass (stats kernel + scale/shift kernel)
# ----------------------------------------------------------------------------
def _bn_stats_kernel(x_ref, sum_ref, sumsq_ref):
    @pl.when(pl.program_id(1) == 0)
    def _():
        sum_ref[...] = jnp.zeros_like(sum_ref)
        sumsq_ref[...] = jnp.zeros_like(sumsq_ref)

    x = x_ref[...]
    sum_ref[...] += jnp.sum(x, axis=0, keepdims=True, dtype=jnp.float32)
    sumsq_ref[...] += jnp.sum(x * x, axis=0, keepdims=True, dtype=jnp.float32)


def _bn_affine_kernel(x_ref, a_ref, b_ref, o_ref):
    o_ref[...] = (x_ref[...] * a_ref[...] + b_ref[...]).astype(o_ref.dtype)


def _bn_two_pass(x, gamma, beta, eps, budget, limit):
    N, C = x.shape
    itemsize = x.dtype.itemsize

    tc = min(C, 512) if C % 128 == 0 else C
    # Rows per block: ~5 block-sized buffers (double-buffered in + out + temp).
    tn = max(8, (budget // (5 * tc * itemsize)) // 8 * 8)
    tn = min(tn, _round_up(N, 8))
    Np = _round_up(N, tn)
    # Zero-padded rows contribute 0 to sum/sumsq; we divide by the true N below.
    xp = x if Np == N else jnp.pad(x, ((0, Np - N), (0, 0)))

    sums, sumsqs = pl.pallas_call(
        _bn_stats_kernel,
        out_shape=(jax.ShapeDtypeStruct((1, C), jnp.float32),
                   jax.ShapeDtypeStruct((1, C), jnp.float32)),
        grid_spec=pltpu.PrefetchScalarGridSpec(
            num_scalar_prefetch=0,
            grid=(C // tc, Np // tn),
            in_specs=[pl.BlockSpec((tn, tc), lambda j, r: (r, j))],
            out_specs=(pl.BlockSpec((1, tc), lambda j, r: (0, j)),
                       pl.BlockSpec((1, tc), lambda j, r: (0, j))),
        ),
        compiler_params=pltpu.CompilerParams(
            dimension_semantics=("parallel", "arbitrary"),
            vmem_limit_bytes=limit,
        ),
        cost_estimate=pl.CostEstimate(
            flops=int(3 * Np * C),
            transcendentals=0,
            bytes_accessed=int(Np * C * itemsize + 8 * C),
        ),
    )(xp)

    inv_n = jnp.float32(1.0 / N)
    mean = sums * inv_n
    var = jnp.maximum(sumsqs * inv_n - mean * mean, 0.0)
    inv_std = jax.lax.rsqrt(var + eps)
    a = gamma.reshape(1, C).astype(jnp.float32) * inv_std
    b = beta.reshape(1, C).astype(jnp.float32) - mean * a

    yp = pl.pallas_call(
        _bn_affine_kernel,
        out_shape=jax.ShapeDtypeStruct((Np, C), x.dtype),
        grid_spec=pltpu.PrefetchScalarGridSpec(
            num_scalar_prefetch=0,
            grid=(Np // tn, C // tc),
            in_specs=[
                pl.BlockSpec((tn, tc), lambda r, j: (r, j)),
                pl.BlockSpec((1, tc), lambda r, j: (0, j)),
                pl.BlockSpec((1, tc), lambda r, j: (0, j)),
            ],
            out_specs=pl.BlockSpec((tn, tc), lambda r, j: (r, j)),
        ),
        compiler_params=pltpu.CompilerParams(
            dimension_semantics=("parallel", "parallel"),
            vmem_limit_bytes=limit,
        ),
        cost_estimate=pl.CostEstimate(
            flops=int(2 * Np * C),
            transcendentals=0,
            bytes_accessed=int(2 * Np * C * itemsize + 8 * C),
        ),
    )(xp, a, b)
    return yp[:N] if Np != N else yp


# ----------------------------------------------------------------------------
# Dispatch wrapper
# ----------------------------------------------------------------------------
def batchnorm1d_pallas(x, gamma, beta, *, eps=1e-5, force_two_pass=False):
    """BatchNorm1d forward (training-mode batch stats) for x of shape (N, C)."""
    N, C = x.shape
    budget, limit = _vmem_plan()
    itemsize = x.dtype.itemsize

    # Can a full-batch column slab (narrowest legal feature tile) fit in VMEM?
    min_tc = 128 if C % 128 == 0 else C
    per_col = N * (4 * itemsize + 8)
    if (not force_two_pass) and per_col * min_tc <= budget:
        return _bn_fused(x, gamma, beta, eps, budget, limit)
    return _bn_two_pass(x, gamma, beta, eps, budget, limit)


class CustomBatchNormPallas:
    """JAX/Pallas re-implementation of the PyTorch CustomBatchNorm forward."""

    def __init__(self, num_features, eps=1e-5):
        self.eps = eps
        # nn.BatchNorm1d default affine init: weight=1, bias=0
        self.gamma = jnp.ones((num_features,), dtype=jnp.float32)
        self.beta = jnp.zeros((num_features,), dtype=jnp.float32)
        # TODO(synk): running_mean/running_var momentum updates (stateful buffers)
        # are not implemented; they do not change the training-mode forward output.

    def __call__(self, x, force_two_pass=False):
        # TODO(synk): 3-D (N, C, L) BatchNorm1d input path not implemented; 2-D only.
        return batchnorm1d_pallas(x, self.gamma, self.beta, eps=self.eps,
                                  force_two_pass=force_two_pass)


if __name__ == "__main__":
    eps = 1e-5
    key = jax.random.PRNGKey(0)

    def ref_bn(x, gamma, beta):
        mean = x.mean(axis=0, keepdims=True)
        var = x.var(axis=0, keepdims=True)  # biased (ddof=0), matches PyTorch
        return (x - mean) / jnp.sqrt(var + eps) * gamma + beta

    # --- fused single-pass path (small batch, the default regime) ---
    batch, num_features = 8, 256
    x = jax.random.normal(key, (batch, num_features), dtype=jnp.float32) * 2.0 + 0.5
    model = CustomBatchNormPallas(num_features, eps=eps)
    out = jax.block_until_ready(model(x))
    assert out.shape == (batch, num_features)
    assert jnp.allclose(out, ref_bn(x, model.gamma, model.beta), atol=1e-4, rtol=1e-4)

    # --- two-pass (stats + scale/shift) large-N fallback path, forced here ---
    batch2 = 64
    x2 = jax.random.normal(jax.random.PRNGKey(1), (batch2, num_features),
                           dtype=jnp.float32) * 1.5 - 0.25
    out2 = jax.block_until_ready(model(x2, force_two_pass=True))
    assert out2.shape == (batch2, num_features)
    assert jnp.allclose(out2, ref_bn(x2, model.gamma, model.beta), atol=1e-4, rtol=1e-4)

    print("KERNEL_OK")
</pallas_src>

<mosaic_0001>
module attributes {stable_mosaic.version = 11 : i64} {
  func.func @_bn_fused_kernel(%arg0: i32, %arg1: memref<8x128xf32, #tpu.memory_space<vmem>>, %arg2: memref<1x256xf32, #tpu.memory_space<vmem>>, %arg3: memref<1x256xf32, #tpu.memory_space<vmem>>, %arg4: memref<8x128xf32, #tpu.memory_space<vmem>>) attributes {dimension_semantics = [#tpu.dimension_semantics<parallel>], iteration_bounds = array<i64: 2>, scalar_prefetch = 0 : i64, scratch_operands = 0 : i64, tpu.core_type = #tpu.core_type<tc>, window_params = [{transform_indices = @transform_0, window_bounds = array<i64: 8, 128>}, {pipeline_mode = #tpu.pipeline_mode<synchronous>, transform_indices = @transform_1, window_bounds = array<i64: 1, 256>}, {pipeline_mode = #tpu.pipeline_mode<synchronous>, transform_indices = @transform_2, window_bounds = array<i64: 1, 256>}, {transform_indices = @transform_3, window_bounds = array<i64: 8, 128>}]} {
    %c0 = arith.constant 0 : index
    %c0_0 = arith.constant 0 : index
    %0 = vector.load %arg1[%c0, %c0_0] : memref<8x128xf32, #tpu.memory_space<vmem>>, vector<8x128xf32>
    %cst = arith.constant dense<0.000000e+00> : vector<128xf32>
    %1 = vector.multi_reduction <add>, %0, %cst [0] : vector<8x128xf32> to vector<128xf32>
    %2 = vector.shape_cast %1 : vector<128xf32> to vector<1x128xf32>
    %3 = arith.mulf %0, %0 : vector<8x128xf32>
    %cst_1 = arith.constant dense<0.000000e+00> : vector<128xf32>
    %4 = vector.multi_reduction <add>, %3, %cst_1 [0] : vector<8x128xf32> to vector<128xf32>
    %5 = vector.shape_cast %4 : vector<128xf32> to vector<1x128xf32>
    %cst_2 = arith.constant 1.250000e-01 : f32
    %6 = vector.broadcast %cst_2 : f32 to vector<1x128xf32>
    %7 = arith.mulf %2, %6 : vector<1x128xf32>
    %cst_3 = arith.constant 1.250000e-01 : f32
    %8 = vector.broadcast %cst_3 : f32 to vector<1x128xf32>
    %9 = arith.mulf %5, %8 : vector<1x128xf32>
    %10 = arith.mulf %7, %7 : vector<1x128xf32>
    %11 = arith.subf %9, %10 : vector<1x128xf32>
    %cst_4 = arith.constant 0.000000e+00 : f32
    %12 = vector.broadcast %cst_4 : f32 to vector<1x128xf32>
    %13 = arith.maximumf %11, %12 : vector<1x128xf32>
    %cst_5 = arith.constant 9.99999974E-6 : f32
    %14 = vector.broadcast %cst_5 : f32 to vector<1x128xf32>
    %15 = arith.addf %13, %14 : vector<1x128xf32>
    %16 = math.rsqrt %15 : vector<1x128xf32>
    %c128_i32 = arith.constant 128 : i32
    %17 = arith.muli %arg0, %c128_i32 : i32
    %18 = tpu.assume_multiple %17, 128 : i32
    %c0_6 = arith.constant 0 : index
    %19 = arith.index_cast %18 : i32 to index
    %20 = vector.load %arg2[%c0_6, %19] : memref<1x256xf32, #tpu.memory_space<vmem>>, vector<1x128xf32>
    %c0_7 = arith.constant 0 : index
    %21 = arith.index_cast %18 : i32 to index
    %22 = vector.load %arg3[%c0_7, %21] : memref<1x256xf32, #tpu.memory_space<vmem>>, vector<1x128xf32>
    %23 = arith.mulf %20, %16 : vector<1x128xf32>
    %24 = arith.mulf %7, %23 : vector<1x128xf32>
    %25 = arith.subf %22, %24 : vector<1x128xf32>
    %26 = vector.broadcast %23 : vector<1x128xf32> to vector<8x128xf32>
    %27 = arith.mulf %0, %26 : vector<8x128xf32>
    %28 = vector.broadcast %25 : vector<1x128xf32> to vector<8x128xf32>
    %29 = arith.addf %27, %28 : vector<8x128xf32>
    %c0_8 = arith.constant 0 : index
    %c0_9 = arith.constant 0 : index
    %30 = vector.load %arg4[%c0_8, %c0_9] : memref<8x128xf32, #tpu.memory_space<vmem>>, vector<8x128xf32>
    tpu.vector_store %arg4[%c0_8, %c0_9], %29 {strides = array<i32>} : memref<8x128xf32, #tpu.memory_space<vmem>>, vector<8x128xf32>,
    return
  }
  func.func @transform_0(%arg0: i32) -> (i32, i32) {
    %c0_i32 = arith.constant 0 : i32
    %c0_i32_0 = arith.constant 0 : i32
    return %c0_i32, %arg0 : i32, i32
  }
  func.func @transform_1(%arg0: i32) -> (i32, i32) {
    %c0_i32 = arith.constant 0 : i32
    %c0_i32_0 = arith.constant 0 : i32
    %c0_i32_1 = arith.constant 0 : i32
    return %c0_i32, %c0_i32_0 : i32, i32
  }
  func.func @transform_2(%arg0: i32) -> (i32, i32) {
    %c0_i32 = arith.constant 0 : i32
    %c0_i32_0 = arith.constant 0 : i32
    %c0_i32_1 = arith.constant 0 : i32
    return %c0_i32, %c0_i32_0 : i32, i32
  }
  func.func @transform_3(%arg0: i32) -> (i32, i32) {
    %c0_i32 = arith.constant 0 : i32
    %c0_i32_0 = arith.constant 0 : i32
    return %c0_i32, %arg0 : i32, i32
  }
}

</mosaic_0001>

<bundles_post_ra>
// kernel: tpu_custom_call.1
= control target key start
LH: loop header
LB: loop body
LE: loop exit
PB: predicated region body
PF: predicated region fallthrough
CT: control target
= control target key end

     0   :  { %8 = vsyncpa [#allocation3], 0  ;;  %s741_s0 = inlined_call_operand.hbm [shape: f32[8,256], index: 0, kind: input, shape index: {}]   ;;  %s742_s1 = inlined_call_operand.hbm [shape: f32[1,256], index: 1, kind: input, shape index: {}]   ;;  %s743_s2 = inlined_call_operand.vmem [shape: f32[1,256], index: 2, kind: input, shape index: {}]   ;;  %s744_s3 = inlined_call_operand.hbm [shape: f32[8,256], index: 3, kind: output, shape index: {}]  }
   0x1   :  { %10 = vsyncpa [#allocation3 + $0x1], 0 }
   0x2   :  { %11 = vsyncpa [#allocation6], 0 }
   0x3   :  { %12 = vsyncpa [#allocation4], 0 }
   0x4   :  { %14 = vsyncpa [#allocation4 + $0x1], 0  ;;  %s562_s12 = smov 0   ;;  %s564_s13 = smov 0  }
   0x5   :  { %s566_s14 = smov 0   ;;  %s568_s15 = smov 0  }
   0x6 LB: > { %s583_s16 = sadd.s32 4294967295, %s537_s15   ;;  %s341_s17 = sadd.s32 4294967294, %s537_s15   ;;  %s537_s15 = sphi %s568_s15, %s767_s15   ;;  %s533_s14 = sphi %s566_s14, %s766_s14   ;;  %s529_s13 = sphi %s564_s13, %s765_s13   ;;  %s525_s12 = sphi %s562_s12, %s764_s12  }
   0x7   : > { %p40_p0 = scmp.ne.s32.totalorder %s529_s13, %s525_s12  ;;  %p745_p1 = scmp.eq.s32.totalorder %s583_s16, 0 }
   0x8   : > { %p112_p3 = scmp.eq.s32.totalorder %s341_s17, 1  ;;  %p342_p5 = scmp.ge.s32.totalorder %s537_s15, 1 }
   0x9   : > { %p592_p4 = por %p745_p1, %p40_p0  ;;  %p119_p7 = scmp.lt.s32.totalorder %s537_s15, 3 }
   0xa   : > { %p597_p6 = por %p112_p3, %p40_p0  ;;  %s539_s21 = smov [#allocation5]  }
   0xb   : > { %s749_s18 = scalar_select %p592_p4, 1, 0 }
   0xc   : > { %s750_s19 = scalar_select %p597_p6, 1, 0 }
   0xd   : > { %p602_p8 = pnand %p342_p5, %p119_p7  ;;  %s132_s22 = sshll.u32 %s539_s21, 4  ;;  %s133_s22 = int_to_ptr.vmem [resolvable:$true] %s132_s22 }
   0xe   : > { %s610_s23 = sadd.s32 1, %s537_s15   ;;  %s27_s27 = sadd.s32 1, %s533_s14 }
   0xf   : > { %s751_s20 = scalar_select %p602_p8, 1, 0 }
  0x10   : > { %p364_p10 = pneg %p602_p8  ;;  %s24_s25 = ssub.s32 %s537_s15, %s610_s23 }
  0x11   : > { %p620_p12 = scmp.eq.s32.totalorder %s24_s25, 0  ;;  %p34_p13 = scmp.ne.s32.totalorder %s533_s14, %s529_s13 }
  0x12   : > { %p614_p11 = pnand %p364_p10, %p745_p1  ;;  %s426_s28 = scalar_lea.vmem %s133_s22, 32 }
  0x13   : > { %p427_p3 = scmp.ne.s32.totalorder %s133_s22, %s426_s28  ;;  %p434_p9 = scmp.lt.s32.totalorder %s133_s22, %s133_s22 }
  0x14   : > { %p417_p0 = pneg %p614_p11  ;;  %p435_p2 = scmp.lt.s32.totalorder %s426_s28, %s426_s28 }
  0x16   : > { %p429_p5 = pnand %p427_p3, %p417_p0  ;;  %p436_p10 = por %p435_p2, %p434_p9 }
  0x18   : > { %p430_p7 = pneg %p429_p5 }
  0x1a   : > { %p437_p1 = pnand %p436_p10, %p430_p7 }
  0x1c   : > { %440 = shalt.err (!%p437_p1)
}
  0x1d   : > { %367 = dma.hbm_to_vmem [thread:$0]  (!%p614_p11), %s742_s1, 32, %s133_s22, [#allocation6]  }
  0x1e   : > { %s637_s4 = scalar_select %p620_p12, %s533_s14, %s27_s27  }
  0x1f   : > { %p35_p1 = scmp.eq.s32.totalorder %s537_s15, 0  ;;  %p754_p2 = scmp.eq.s32.totalorder %s583_s16, 1 }
  0x20   : > { %p377_p0 = scmp.lt.s32.totalorder %s537_s15, 2  ;;  %s146_s6 = sand.u32 1, %s533_s14  }
  0x21   : > { %p645_p9 = por %p754_p2, %p34_p13  ;;  %p36_p3 = por %p35_p1, %p34_p13 }
  0x22   : > { %s345_s7 = sshll.u32 %s146_s6, 3  ;;  %s346_s8 = sshll.u32 %s537_s15, 7 }
  0x23   : > { %s755_s5 = scalar_select %p645_p9, 1, 0 }
  0x24   : > { %s658_s11 = scalar_lea.hbm %s741_s0, %s346_s8  ;;  %s150_s17 = scalar_lea.vmem [#allocation2], %s345_s7 }
  0x25   : > { %s157_s21 = sshll.u32 %s150_s17, 4  ;;  %p660_p11 = pnand %p377_p0, %p36_p3  ;;  %s158_s21 = int_to_ptr.vmem [resolvable:$true] %s157_s21 }
  0x26   : > { %s147_s24 = scalar_lea.sflag [#allocation3], %s146_s6  ;;  %s441_s25 = scalar_lea.hbm %s658_s11, 128 }
  0x27   : > { %p442_p12 = scmp.ne.s32.totalorder %s658_s11, %s441_s25  ;;  %p443_p13 = pneg %p660_p11 }
  0x28   : > { %s446_s28 = scalar_lea.hbm %s741_s0, 256  ;;  %p447_p10 = scmp.lt.s32.totalorder %s658_s11, %s741_s0 }
  0x29   : > { %p444_p5 = pnand %p443_p13, %p442_p12  ;;  %p448_p1 = scmp.lt.s32.totalorder %s446_s28, %s441_s25 }
  0x2b   : > { %p445_p7 = pneg %p444_p5  ;;  %p449_p2 = por %p448_p1, %p447_p10 }
  0x2d   : > { %p450_p0 = pnand %p449_p2, %p445_p7 }
  0x2f   : > { %453 = shalt.err (!%p450_p0)
}
  0x30   : > { %s454_s7 = scalar_lea.vmem %s158_s21, 128  ;;  %s540_s6 = smov [#allocation2]  }
  0x31   : > { %p455_p3 = scmp.ne.s32.totalorder %s158_s21, %s454_s7  ;;  %s459_s8 = sshll.u32 %s540_s6, 4  ;;  %s460_s8 = int_to_ptr.vmem [resolvable:$false] %s459_s8 }
  0x32   : > { %s461_s9 = scalar_lea.vmem %s460_s8, 256  ;;  %p462_p12 = scmp.lt.s32.totalorder %s158_s21, %s460_s8 }
  0x33   : > { %p457_p6 = pnand %p455_p3, %p443_p13  ;;  %p463_p5 = scmp.lt.s32.totalorder %s461_s9, %s454_s7 }
  0x35   : > { %p458_p9 = pneg %p457_p6  ;;  %p464_p4 = por %p463_p5, %p462_p12 }
  0x37   : > { %p465_p8 = pnand %p464_p4, %p458_p9 }
  0x39   : > { %468 = shalt.err (!%p465_p8)
}
  0x3a   : > { %371 = dma.hbm_to_vmem [thread:$0]  (!%p660_p11), %s658_s11, 128, %s158_s21, %s147_s24  }
  0x3b   : > { %p757_p7 = scmp.ne.s32.totalorder %s751_s20, 0 }
  0x3c   : > { %s681_s10 = sand.u32 (!%p757_p7), 1, %s529_s13   ;;  %p758_p4 = scmp.ne.s32.totalorder (!%p757_p7), %s749_s18, 0 }
  0x3d   : > { %166 = sbr.rel (%p757_p7) target bundleno = 130 (0x82), region = 32  ;;  %s348_s17 = sshll.u32 (!%p757_p7), %s681_s10, 3 }
  0x3e   : > { %s169_s25 = scalar_lea.sflag (!%p757_p7), [#allocation3], %s681_s10  ;;  %s172_s26 = scalar_lea.vmem (!%p757_p7), [#allocation2], %s348_s17 }
  0x42   : > { %512 = dma.done.wait (%p758_p4), %s169_s25, 128  }
  0x43   : > { %514 = vsyncadd (%p758_p4), %s169_s25, 4294967168  ;;  %p759_p6 = scmp.eq.s32.totalorder %s583_s16, 0 }
  0x45   : > { %516 = dma.done.wait (%p759_p6), [#allocation6], 32   ;;  %p760_p8 = pmov %p759_p6 }
  0x46   : > { %v199_v0 = vld [vmem:[%s172_s26] sm:$0xff]  ;;  %s351_s18 = sshll.u32 %s583_s16, 7  ;;  %v231_v20 = vlaneseq  ;;  %s198_s16 = scalar_lea.vmem [#allocation7], %s348_s17 }
  0x47   : > { %518 = vsyncadd (%p760_p8), [#allocation6], 4294967264  ;;  %v200_v1 = vrot.slane %v199_v0, 4  ;;  %v206_v2 = vmul.f32 %v199_v0, %v199_v0  ;;  %s221_s20 = sshra.s32 %s351_s18, 7  ;;  %s259_s27 = sshll.u32 %s198_s16, 4  ;;  %s701_s27 = int_to_ptr.vmem [resolvable:$true] %s259_s27 }
  0x48   : > { %v232_v21 = vshrl.u32 %v231_v20, 7  ;;  %s223_s11 = scalar_lea.vmem [#allocation5], %s221_s20  ;;  %s225_s24 = scalar_lea.vmem %s743_s2, %s221_s20 }
  0x49   : > { %v201_v3 = vadd.f32 %v200_v1, %v199_v0  ;;  %v207_v4 = vrot.slane %v206_v2, 4  ;;  %v224_v22 = vld [vmem:[%s223_s11] sm:$0x1]  ;;  %s257_s30 = scalar_lea.hbm %s744_s3, %s351_s18  ;;  %s246_s7 = scalar_lea.sflag [#allocation4], %s681_s10 }
  0x4a   : > { %v233_v23 = vsub.s32 0, %v232_v21  ;;  %v226_v26 = vld [vmem:[%s225_s24] sm:$0x1]  ;;  %s469_s6 = scalar_lea.vmem %s701_s27, 128  ;;  %p761_p11 = scmp.ne.s32.totalorder %s755_s5, 0 }
  0x4b   : > { %v202_v5 = vrot.slane %v201_v3, 2  ;;  %v208_v6 = vadd.f32 %v207_v4, %v206_v2  ;;  %p470_p9 = scmp.ne.s32.totalorder %s701_s27, %s469_s6  ;;  %s541_s8 = smov [#allocation7]  }
  0x4c   : > { %s473_s9 = sshll.u32 %s541_s8, 4  ;;  %s474_s9 = int_to_ptr.vmem [resolvable:$false] %s473_s9 }
  0x4d   : > { %v203_v7 = vadd.f32 %v202_v5, %v201_v3  ;;  %v209_v8 = vrot.slane %v208_v6, 2  ;;  %p471_p13 = pnand %p470_p9, %p761_p11  ;;  %s475_s17 = scalar_lea.vmem %s474_s9, 256 }
  0x4e   : > { %p476_p1 = scmp.lt.s32.totalorder %s701_s27, %s474_s9  ;;  %p477_p2 = scmp.lt.s32.totalorder %s475_s17, %s469_s6 }
  0x4f   : > { %v204_v9 = vrot.slane %v203_v7, 1  ;;  %v210_v10 = vadd.f32 %v209_v8, %v208_v6  ;;  %p472_p10 = pneg %p471_p13 }
  0x50   : > { %p478_p0 = por %p477_p2, %p476_p1 }
  0x51   : > { %v205_v11 = vadd.f32 %v204_v9, %v203_v7  ;;  %v211_v12 = vrot.slane %v210_v10, 1 }
  0x52   : > { %p479_p3 = pnand %p478_p0, %p472_p10 }
  0x53   : > { %v212_v13 = vadd.f32 %v211_v12, %v210_v10  ;;  %v213_v14 = vmul.f32 0.125, %v205_v11 }
  0x55   : > { %v214_v15 = vmul.f32 0.125, %v212_v13  ;;  %v215_v16 = vmul.f32 %v213_v14, %v213_v14 }
  0x57   : > { %v216_v17 = vsub.f32 %v214_v15, %v215_v16 }
  0x59   : > { %v217_v18 = vmax.f32 %v216_v17, 0.0 }
  0x5b   : > { %v218_v19 = vadd.f32 1e-05, %v217_v18 }
  0x5d   : > { %413 = vrsqrt.f32 %v218_v19 }
  0x6a   : > { %v414_v24 = vpop.eup %413 }
  0x6b   : > { %v227_v25 = vmul.f32 %v414_v24, %v224_v22 }
  0x6d   : > { %v228_v27 = vmul.f32 %v227_v25, %v213_v14  ;;  %v234_v28 = vrot.slane %v227_v25, %v233_v23 }
  0x6f   : > { %v229_v29 = vsub.f32 %v226_v26, %v228_v27  ;;  %v236_v30 = vmul.f32 %v234_v28, %v199_v0 }
  0x71   : > { %v241_v31 = vrot.slane %v229_v29, %v233_v23 }
  0x73   : > { %v243_v32 = vadd.f32 %v241_v31, %v236_v30 }
  0x75   : > { %244 = vst [vmem:[%s198_s16] sm:$0xff] %v243_v32 }
  0x76   : > { %482 = shalt.err (!%p479_p3)
}
  0x77   : > { %s483_s25 = scalar_lea.hbm %s257_s30, 128  ;;  %s487_s18 = scalar_lea.hbm %s744_s3, 256 }
  0x78   : > { %p484_p12 = scmp.ne.s32.totalorder %s257_s30, %s483_s25  ;;  %p488_p4 = scmp.lt.s32.totalorder %s257_s30, %s744_s3 }
  0x79   : > { %p489_p6 = scmp.lt.s32.totalorder %s487_s18, %s483_s25 }
  0x7a   : > { %p485_p5 = pnand %p484_p12, %p761_p11 }
  0x7b   : > { %p490_p8 = por %p489_p6, %p488_p4 }
  0x7c   : > { %p486_p7 = pneg %p485_p5 }
  0x7e   : > { %p491_p9 = pnand %p490_p8, %p486_p7 }
  0x80   : > { %494 = shalt.err (!%p491_p9)
}
  0x81   : > { %362 = dma.vmem_to_hbm [thread:$0]  (%p761_p11), %s701_s27, 128, %s257_s30, %s246_s7  }
  0x82 PF: > { %s271_s21 = sand.u32 1, %s525_s12   ;;  %p762_p13 = scmp.ne.s32.totalorder %s750_s19, 0 }
  0x83   : > { %p763_p10 = scmp.ge.s32.totalorder %s537_s15, 2  ;;  %s272_s22 = scalar_lea.sflag [#allocation4], %s271_s21 }
  0x85   : > { %p373_p1 = pnand %p763_p10, %p762_p13 }
  0x87   : > { %p374_p2 = pneg %p373_p1 }
  0x89   : > { %520 = dma.done.wait (%p374_p2), %s272_s22, 128  }
  0x8a   : > { %522 = vsyncadd (%p374_p2), %s272_s22, 4294967168  ;;  %p17_p0 = scmp.ge.s32.totalorder %s610_s23, 4   ;;  %s764_s12 = smov %s529_s13 }
  0x8b   : > { %s765_s13 = smov %s533_s14  ;;  %s766_s14 = smov %s637_s4 }
  0x8c   : > { %s767_s15 = smov %s610_s23  ;;  %19 = sbr.rel (!%p17_p0) target bundleno = 6 (0x6), region = 83 }
  0x91   :  { %277 = vsyncpa [#allocation3], 1 }
  0x92   :  { %279 = vsyncpa [#allocation3 + $0x1], 1 }
  0x93   :  { %280 = vsyncpa [#allocation6], 1 }
  0x94   :  { %281 = vsyncpa [#allocation4], 1 }
  0x95   :  { %283 = vsyncpa [#allocation4 + $0x1], 1 }

</bundles_post_ra>
